<compile_context>
chip_gen: v5e
topology: v5e:2x2
jax: 0.10.0
libtpu: 0.0.40
codegen_flags: <defaults>
</compile_context>

<pallas_src>
import functools
import math

import jax
import jax.numpy as jnp
from jax.experimental import pallas as pl
from jax.experimental.pallas import tpu as pltpu


def _round_up(n, m):
    return ((n + m - 1) // m) * m


def _clustering_kernel(x_ref, wt_ref, w2_ref, o_ref, *, alpha, num_clusters,
                       use_bf16_matmul):
    """One batch tile: x (TB, F), wt (F, Kp) = (-2 w)^T, w2 (1, Kp) -> q (TB, K)."""
    x = x_ref[...].astype(jnp.float32)        # (TB, F)
    wt = wt_ref[...]                          # (F, Kp), padded cols are 0
    w2 = w2_ref[...]                          # (1, Kp),  padded cols are 1e30

    # Squared Euclidean distance: ||x||^2 + ||w||^2 - 2<x,w>.
    # The -2 factor is folded into wt by the wrapper, so cross = -2 x @ w^T.
    x2 = jnp.sum(x * x, axis=1, keepdims=True)                      # (TB, 1)
    if use_bf16_matmul:
        cross = jnp.dot(x.astype(jnp.bfloat16), wt.astype(jnp.bfloat16),
                        preferred_element_type=jnp.float32)         # (TB, Kp)
    else:
        cross = jnp.dot(x, wt, preferred_element_type=jnp.float32)  # (TB, Kp)
    d = jnp.maximum(x2 + w2 + cross, 0.0)                           # fp guard

    # Student's t kernel -- specialize alpha == 1.0 (exponent == 1, no pow).
    if alpha == 1.0:
        q = 1.0 / (1.0 + d)
    else:
        q = (1.0 + d * (1.0 / alpha)) ** (-(alpha + 1.0) / 2.0)

    # Padded columns carry d ~ 1e30 -> q ~ 0, so they don't pollute the sum.
    # Row-normalize (exact reciprocal: row sums must hit 1 to 1e-6).
    q = q * pl.reciprocal(jnp.sum(q, axis=1, keepdims=True), approx=False)

    if q.shape[1] != num_clusters:
        q = q[:, :num_clusters]              # drop padded lanes before store
    o_ref[...] = q.astype(o_ref.dtype)


def _vmem_capacity_bytes():
    """Physical per-core VMEM; conservative (v7x, 64 MiB) fallback."""
    try:
        info = pltpu.get_tpu_info()
        for name in ("vmem_capacity_bytes", "vmem_size_bytes", "vmem_bytes"):
            cap = getattr(info, name, None)
            if cap:
                return int(cap)
    except Exception:
        pass
    return 64 * 1024 * 1024


def _choose_block_b(batch, num_features, k_out, k_padded, requested, vmem_limit):
    """Largest batch tile (multiple of 8) under an honest VMEM budget, clamped
    so the grid keeps >= ~4 steps (megacore sharding + pipeline overlap)."""
    # Grid-invariant buffers: double-buffered wt (F, Kp) and w2 (1, Kp).
    fixed = 2 * 4 * (num_features * k_padded + k_padded)
    # Per batch row: double-buffered x tile + double-buffered out tile, plus
    # in-kernel f32 temporaries (x copy, cross/d/q and store staging).
    per_row = 4 * (2 * num_features + 2 * k_out      # pipelined DMA tiles
                   + num_features + 4 * k_padded)    # in-kernel temporaries
    budget = max(vmem_limit - fixed - (4 << 20), 8 * per_row)   # 4 MiB slack
    tb = budget // per_row
    if requested is not None:
        tb = min(tb, requested)
    tb = min(tb, _round_up(pl.cdiv(batch, 4), 8))    # keep >= ~4 grid steps
    tb = max(8, (tb // 8) * 8)
    return int(tb)


def clustering_layer(x, weight, alpha=1.0, block_b=None, use_bf16_matmul=False):
    """x: (B, F), weight: (K, F) -> soft assignments q: (B, K) float32."""
    B, F = x.shape
    K, Fw = weight.shape
    assert F == Fw, "feature dims of x and weight must match"

    w32 = weight.astype(jnp.float32)

    # Lane-dense padded cluster dim for the MXU contraction and row reduction.
    Kp = _round_up(max(K, 1), 128)
    # Pre-transposed, -2-folded weights; padded columns contribute 0 to cross.
    wt = jnp.zeros((F, Kp), jnp.float32).at[:, :K].set((-2.0 * w32).T)
    # ||w||^2 with padded columns poisoned to a large *finite* value so padded
    # q ~ 0 without an in-kernel mask (finite keeps the pow path NaN-free).
    w2 = jnp.full((1, Kp), 1e30, jnp.float32).at[:, :K].set(
        jnp.sum(w32 * w32, axis=1)[None, :])

    vmem_cap = _vmem_capacity_bytes()
    vmem_limit = min(vmem_cap * 3 // 4, 96 * 1024 * 1024)   # 48 MiB v7x / 96 MiB v5e-v6e
    TB = _choose_block_b(B, F, K, Kp, block_b, vmem_limit)

    grid = (pl.cdiv(B, TB),)   # ragged last block handled by Pallas masking
    kernel = functools.partial(
        _clustering_kernel, alpha=float(alpha), num_clusters=K,
        use_bf16_matmul=use_bf16_matmul)

    itemsize = jnp.dtype(x.dtype).itemsize
    cost = pl.CostEstimate(
        flops=2 * B * F * Kp + 8 * B * Kp,
        transcendentals=B * Kp,
        bytes_accessed=B * F * itemsize + 4 * (F * Kp + Kp + B * K),
    )

    # TODO(synk): for K << 128 a (K, TB) tile orientation (batch on lanes) would
    # also cut the padded-lane compute; left as-is pending a benchmark since the
    # kernel is HBM-bound at DEC sizes and the narrow output already fixes writeback.
    out = pl.pallas_call(
        kernel,
        out_shape=jax.ShapeDtypeStruct((B, K), jnp.float32),
        grid=grid,
        in_specs=[
            pl.BlockSpec((TB, F), lambda i: (i, 0)),   # batch-tiled x
            pl.BlockSpec((F, Kp), lambda i: (0, 0)),   # grid-invariant (-2 w)^T
            pl.BlockSpec((1, Kp), lambda i: (0, 0)),   # grid-invariant ||w||^2
        ],
        out_specs=pl.BlockSpec((TB, K), lambda i: (i, 0)),   # narrow, no slice pass
        compiler_params=pltpu.CompilerParams(
            dimension_semantics=("parallel",),          # 2x on v7x megacore
            vmem_limit_bytes=int(vmem_limit),
        ),
        cost_estimate=cost,
    )(x, wt, w2)

    return out


def _xavier_uniform(key, shape):
    # torch.nn.init.xavier_uniform_ for a 2D (out, in) tensor:
    # bound = sqrt(6 / (fan_in + fan_out)), fan_in = shape[1], fan_out = shape[0]
    fan_out, fan_in = shape
    bound = math.sqrt(6.0 / (fan_in + fan_out))
    return jax.random.uniform(key, shape, jnp.float32, -bound, bound)


def _reference(x, w, alpha=1.0):
    d = jnp.sum((x[:, None, :] - w[None, :, :]) ** 2, axis=2)
    q = 1.0 / (1.0 + d / alpha)
    q = q ** ((alpha + 1.0) / 2.0)
    return q / jnp.sum(q, axis=1, keepdims=True)


if __name__ == "__main__":
    batch = 8
    num_features = 32
    num_clusters = 16
    alpha = 1.0

    key = jax.random.PRNGKey(0)
    kx, kw, kx2 = jax.random.split(key, 3)
    x = jax.random.normal(kx, (batch, num_features), jnp.float32)
    weight = _xavier_uniform(kw, (num_clusters, num_features))

    q = jax.block_until_ready(clustering_layer(x, weight, alpha=alpha))
    q_ref = _reference(x, weight, alpha=alpha)
    assert q.shape == (batch, num_clusters)
    assert jnp.allclose(q, q_ref, rtol=1e-5, atol=1e-6), "mismatch vs reference"
    assert jnp.allclose(jnp.sum(q, axis=1), 1.0, rtol=1e-5, atol=1e-6)

    # alpha != 1 (pow path) with a ragged batch (B % TB != 0) to exercise the
    # masked last grid block and the poisoned padded columns.
    x2 = jax.random.normal(kx2, (10, num_features), jnp.float32)
    q2 = jax.block_until_ready(clustering_layer(x2, weight, alpha=2.0))
    q2_ref = _reference(x2, weight, alpha=2.0)
    assert q2.shape == (10, num_clusters)
    assert jnp.allclose(q2, q2_ref, rtol=1e-5, atol=1e-6), "mismatch (alpha=2, ragged)"
    assert jnp.allclose(jnp.sum(q2, axis=1), 1.0, rtol=1e-5, atol=1e-6)

    print("KERNEL_OK")
</pallas_src>

<mosaic_0001>
module attributes {stable_mosaic.version = 11 : i64} {
  func.func @_clustering_kernel(%arg0: i32, %arg1: memref<8x32xf32, #tpu.memory_space<vmem>>, %arg2: memref<32x128xf32, #tpu.memory_space<vmem>>, %arg3: memref<1x128xf32, #tpu.memory_space<vmem>>, %arg4: memref<8x16xf32, #tpu.memory_space<vmem>>) attributes {dimension_semantics = [#tpu.dimension_semantics<parallel>], iteration_bounds = array<i64: 1>, scalar_prefetch = 0 : i64, scratch_operands = 0 : i64, tpu.core_type = #tpu.core_type<tc>, window_params = [{transform_indices = @transform_0, window_bounds = array<i64: 8, 32>}, {pipeline_mode = #tpu.pipeline_mode<synchronous>, transform_indices = @transform_1, window_bounds = array<i64: 32, 128>}, {pipeline_mode = #tpu.pipeline_mode<synchronous>, transform_indices = @transform_2, window_bounds = array<i64: 1, 128>}, {transform_indices = @transform_3, window_bounds = array<i64: 8, 16>}]} {
    %c0 = arith.constant 0 : index
    %c0_0 = arith.constant 0 : index
    %0 = vector.load %arg1[%c0, %c0_0] : memref<8x32xf32, #tpu.memory_space<vmem>>, vector<8x32xf32>
    %c0_1 = arith.constant 0 : index
    %c0_2 = arith.constant 0 : index
    %1 = vector.load %arg2[%c0_1, %c0_2] : memref<32x128xf32, #tpu.memory_space<vmem>>, vector<32x128xf32>
    %c0_3 = arith.constant 0 : index
    %c0_4 = arith.constant 0 : index
    %2 = vector.load %arg3[%c0_3, %c0_4] : memref<1x128xf32, #tpu.memory_space<vmem>>, vector<1x128xf32>
    %3 = arith.mulf %0, %0 : vector<8x32xf32>
    %cst = arith.constant dense<0.000000e+00> : vector<8xf32>
    %4 = vector.multi_reduction <add>, %3, %cst [1] : vector<8x32xf32> to vector<8xf32>
    %5 = vector.shape_cast %4 : vector<8xf32> to vector<8x1xf32>
    %cst_5 = arith.constant dense<0.000000e+00> : vector<8x128xf32>
    %6 = tpu.matmul %0, %1, %cst_5 {dimension_numbers = #tpu.dot_dimension_numbers<[1], [0], [0], [1], [0, 0, 1, 1], [], []>} : vector<8x32xf32>, vector<32x128xf32>, vector<8x128xf32> -> vector<8x128xf32>
    %7 = vector.broadcast %5 : vector<8x1xf32> to vector<8x128xf32>
    %8 = vector.broadcast %2 : vector<1x128xf32> to vector<8x128xf32>
    %9 = arith.addf %7, %8 : vector<8x128xf32>
    %10 = arith.addf %9, %6 : vector<8x128xf32>
    %cst_6 = arith.constant 0.000000e+00 : f32
    %11 = vector.broadcast %cst_6 : f32 to vector<8x128xf32>
    %12 = arith.maximumf %10, %11 : vector<8x128xf32>
    %cst_7 = arith.constant 1.000000e+00 : f32
    %13 = vector.broadcast %cst_7 : f32 to vector<8x128xf32>
    %14 = arith.addf %13, %12 : vector<8x128xf32>
    %cst_8 = arith.constant 1.000000e+00 : f32
    %15 = vector.broadcast %cst_8 : f32 to vector<8x128xf32>
    %16 = arith.divf %15, %14 : vector<8x128xf32>
    %cst_9 = arith.constant dense<0.000000e+00> : vector<8xf32>
    %17 = vector.multi_reduction <add>, %16, %cst_9 [1] : vector<8x128xf32> to vector<8xf32>
    %18 = vector.shape_cast %17 : vector<8xf32> to vector<8x1xf32>
    %19 = tpu.reciprocal %18 : vector<8x1xf32> -> vector<8x1xf32>
    %20 = vector.broadcast %19 : vector<8x1xf32> to vector<8x128xf32>
    %21 = arith.mulf %16, %20 : vector<8x128xf32>
    %22 = vector.extract_strided_slice %21 {offsets = [0, 0], sizes = [8, 16], strides = [1, 1]} : vector<8x128xf32> to vector<8x16xf32>
    %c0_10 = arith.constant 0 : index
    %c0_11 = arith.constant 0 : index
    %23 = vector.load %arg4[%c0_10, %c0_11] : memref<8x16xf32, #tpu.memory_space<vmem>>, vector<8x16xf32>
    tpu.vector_store %arg4[%c0_10, %c0_11], %22 {strides = array<i32>} : memref<8x16xf32, #tpu.memory_space<vmem>>, vector<8x16xf32>,
    return
  }
  func.func @transform_0(%arg0: i32) -> (i32, i32) {
    %c0_i32 = arith.constant 0 : i32
    %c0_i32_0 = arith.constant 0 : i32
    return %arg0, %c0_i32 : i32, i32
  }
  func.func @transform_1(%arg0: i32) -> (i32, i32) {
    %c0_i32 = arith.constant 0 : i32
    %c0_i32_0 = arith.constant 0 : i32
    %c0_i32_1 = arith.constant 0 : i32
    return %c0_i32, %c0_i32_0 : i32, i32
  }
  func.func @transform_2(%arg0: i32) -> (i32, i32) {
    %c0_i32 = arith.constant 0 : i32
    %c0_i32_0 = arith.constant 0 : i32
    %c0_i32_1 = arith.constant 0 : i32
    return %c0_i32, %c0_i32_0 : i32, i32
  }
  func.func @transform_3(%arg0: i32) -> (i32, i32) {
    %c0_i32 = arith.constant 0 : i32
    %c0_i32_0 = arith.constant 0 : i32
    return %arg0, %c0_i32 : i32, i32
  }
}

</mosaic_0001>

<bundles_post_ra>
// kernel: tpu_custom_call.1
= control target key start
LH: loop header
LB: loop body
LE: loop exit
PB: predicated region body
PF: predicated region fallthrough
CT: control target
= control target key end

     0   :  { %8 = vsyncpa [#allocation3], 0  ;;  %s264_s0 = inlined_call_operand.hbm [shape: f32[8,32], index: 0, kind: input, shape index: {}]   ;;  %s265_s1 = inlined_call_operand.hbm [shape: f32[32,128], index: 1, kind: input, shape index: {}]   ;;  %s266_s2 = inlined_call_operand.vmem [shape: f32[1,128], index: 2, kind: input, shape index: {}]   ;;  %s267_s3 = inlined_call_operand.hbm [shape: f32[8,16], index: 3, kind: output, shape index: {}]  }
   0x1   :  { %9 = vsyncpa [#allocation6], 0 }
   0x2   :  { %10 = vsyncpa [#allocation4], 0  ;;  %s16_s14 = sshll.u32 %s264_s0, 4  ;;  %s227_s15 = smov [#allocation2]   ;;  %s17_s14 = int_to_ptr.hbm [resolvable:$true] %s16_s14 }
   0x3   :  { %s18_s16 = sshll.u32 %s227_s15, 4  ;;  %s26_s19 = sshll.u32 %s265_s1, 4  ;;  %s19_s16 = int_to_ptr.vmem [resolvable:$true] %s18_s16  ;;  %s27_s19 = int_to_ptr.hbm [resolvable:$true] %s26_s19 }
   0x4   :  { %21 = dma.hbm_to_vmem [thread:$0]  %s17_s14, 128, %s19_s16, [#allocation3]  }
   0x5   :  { %s228_s20 = smov [#allocation5]   ;;  %s229_s22 = smov 128  }
   0x6   :  { %s28_s21 = sshll.u32 %s228_s20, 4  ;;  %s230_s23 = smov 8   ;;  %s29_s21 = int_to_ptr.vmem [resolvable:$true] %s28_s21 }
   0x7   :  { %34 = dma.hbm_to_vmem [thread:$0]  %s27_s19, 512, %s29_s21, [#allocation6], %s229_s22, %s229_s22, %s230_s23  }
   0x8   :  { %221 = dma.done.wait [#allocation3], 128  }
   0x9   :  { %222 = vsyncadd [#allocation3], 4294967168 }
   0xa   :  { %223 = dma.done.wait [#allocation6], 512  }
   0xb   :  { %224 = vsyncadd [#allocation6], 4294966784  ;;  %v49_v0 = vld [vmem:[#allocation5 + $0x18] sm:$0xff]  ;;  %v48_v1 = vld [vmem:[#allocation5 + $0x10] sm:$0xff]  ;;  %vm52_vm0 = vcmask 261120   ;;  %s127_s27 = sshll.u32 %s267_s3, 4  ;;  %s128_s27 = int_to_ptr.hbm [resolvable:$true] %s127_s27 }
   0xc   :  { %71 = vmatpush.msra.mxu0 %v49_v0  ;;  %v45_v2 = vld [vmem:[#allocation2] sm:$0xff]  ;;  %v47_v3 = vld [vmem:[#allocation5 + $0x8] sm:$0xff]  ;;  %v46_v5 = vld [vmem:[#allocation5] sm:$0xff]  ;;  %vm118_vm9 = vcmask 130048  }
   0xd   :  { %v51_v4 = vmul.f32 %v45_v2, %v45_v2  ;;  %v144_v7 = vld [vmem:[%s266_s2] ss:$0 sm:$0xff]  ;;  %s231_s2 = smov [#allocation7]  }
   0xe   :  { %72 = vmatpush.msra.mxu0 %v48_v1  ;;  %s125_s24 = sshll.u32 %s231_s2, 4  ;;  %s126_s24 = int_to_ptr.vmem [resolvable:$true] %s125_s24 }
   0xf   :  { %v53_v6 = vsel %vm52_vm0, %v51_v4, 0.0 }
  0x10   :  { %73 = vmatpush.msra.mxu0 %v47_v3  ;;  %54 = vadd.xlane.f32.xlu0 %v53_v6 }
  0x12   :  { %74 = vmatpush.msra.mxu0 %v46_v5 }
  0x13   :  { %138 = vmatmul.msk.f32.vlgmr.msra.gmra.mxu0 %vm52_vm0, %v45_v2 }
  0x83   :  { %v55_v8 = vpop.xlane.xlu0 %54 }
  0x84   :  { %v82_v9 = vadd.f32 %v144_v7, %v55_v8 }
  0x90   :  { %v76_v10 = vpop.f32.mrf.mxu0 }
  0x91   :  { %v83_v11 = vadd.f32 %v82_v9, %v76_v10 }
  0x93   :  { %v84_v12 = vmax.f32 %v83_v11, 0.0 }
  0x95   :  { %v85_v13 = vadd.f32 1.0, %v84_v12 }
  0x97   :  { %145 = vrcp.f32 %v85_v13  ;;  %v97_v17 = vand.u32 2147483648, %v85_v13  ;;  %v95_v19 = vand.u32 2147483647, %v85_v13  ;;  %vm91_vm2 = vweird.f32 %v85_v13 }
  0x99   :  { %v98_v21 = vor.u32 1.1754944e-38, %v97_v17  ;;  %vm96_vm4 = vcmp.eq.f32.partialorder %v95_v19, 8.507059e+37 }
  0x9d   :  { %v146_v14 = vpop.eup %145 }
  0x9e   :  { %v87_v15 = vmul.f32 %v146_v14, %v85_v13  ;;  %vm92_vm1 = vweird.f32 %v146_v14 }
  0x9f   :  { %vm93_vm3 = vmor %vm91_vm2, %vm92_vm1 }
  0xa0   :  { %v88_v16 = vsub.f32 1.0, %v87_v15 }
  0xa2   :  { %v89_v18 = vmul.f32 %v146_v14, %v88_v16 }
  0xa4   :  { %v90_v20 = vadd.f32 %v146_v14, %v89_v18 }
  0xa6   :  { %v94_v22 = vsel %vm93_vm3, %v146_v14, %v90_v20 }
  0xa7   :  { %v99_v23 = vsel %vm96_vm4, %v98_v21, %v94_v22 }
  0xa8   :  { %101 = vadd.xlane.f32.xlu0 %v99_v23 }
 0x11b   :  { %v102_v24 = vpop.xlane.xlu0 %101 }
 0x11c   :  { %147 = vrcp.f32 %v102_v24  ;;  %v114_v28 = vand.u32 2147483648, %v102_v24  ;;  %v112_v30 = vand.u32 2147483647, %v102_v24  ;;  %vm108_vm6 = vweird.f32 %v102_v24 }
 0x11e   :  { %v115_v32 = vor.u32 1.1754944e-38, %v114_v28  ;;  %vm113_vm8 = vcmp.eq.f32.partialorder %v112_v30, 8.507059e+37 }
 0x122   :  { %v148_v25 = vpop.eup %147 }
 0x123   :  { %v104_v26 = vmul.f32 %v148_v25, %v102_v24  ;;  %vm109_vm5 = vweird.f32 %v148_v25 }
 0x124   :  { %vm110_vm7 = vmor %vm108_vm6, %vm109_vm5 }
 0x125   :  { %v105_v27 = vsub.f32 1.0, %v104_v26 }
 0x127   :  { %v106_v29 = vmul.f32 %v148_v25, %v105_v27 }
 0x129   :  { %v107_v31 = vadd.f32 %v148_v25, %v106_v29 }
 0x12b   :  { %v111_v33 = vsel %vm110_vm7, %v148_v25, %v107_v31 }
 0x12c   :  { %v116_v34 = vsel %vm113_vm8, %v115_v32, %v111_v33 }
 0x12d   :  { %v117_v35 = vmul.f32 %v116_v34, %v99_v23 }
 0x12f   :  { %119 = vst.msk [vmem:[#allocation7] sm:$0xff] %vm118_vm9, %v117_v35 }
 0x130   :  { %130 = dma.vmem_to_hbm [thread:$0]  %s126_s24, 128, %s128_s27, [#allocation4]  }
 0x131   :  { %225 = dma.done.wait [#allocation4], 128  }
 0x132   :  { %226 = vsyncadd [#allocation4], 4294967168 }
 0x133   :  { %135 = vsyncpa [#allocation3], 1 }
 0x134   :  { %136 = vsyncpa [#allocation6], 1 }
 0x135   :  { %137 = vsyncpa [#allocation4], 1 }

</bundles_post_ra>
